<compile_context>
chip_gen: v7x
topology: tpu7x:2x2x1
jax: 0.10.0
libtpu: 0.0.40
codegen_flags: <defaults>
</compile_context>

<pallas_src>
import jax
import jax.numpy as jnp
from jax.experimental import pallas as pl
from jax.experimental.pallas import tpu as pltpu


def _norm_kernel(scale_ref, bias_ref, img_ref, out_ref):
    # scale_ref / bias_ref: (block_r, 1) f32 VMEM columns (per-row channel params)
    # img_ref:              (block_r, block_c) tile in the ORIGINAL image dtype
    # out_ref:              (block_r, block_c) tile in the output dtype
    x = img_ref[...].astype(jnp.float32)          # fused cast (free under DMA)
    out_ref[...] = (x * scale_ref[...] + bias_ref[...]).astype(out_ref.dtype)


def normalize(img, mean, std, *, target_block_bytes=2 * 1024 * 1024):
    """Pallas TPU implementation of (img - mean[:,None,None]) / std[:,None,None]."""
    N, C, H, W = img.shape
    in_dtype = img.dtype
    # Float images keep their dtype; integer images (e.g. uint8) produce f32.
    out_dtype = in_dtype if jnp.issubdtype(in_dtype, jnp.floating) else jnp.float32

    # Per-channel scale/bias in f32 (kept f32 through the FMA; cast on store).
    mean = jnp.asarray(mean, dtype=jnp.float32).reshape(C)
    std = jnp.asarray(std, dtype=jnp.float32).reshape(C)
    inv_std = 1.0 / std
    bias = -mean / std

    R, L = N * C, H * W
    # Row r = n*C + c  ->  channel c = r % C; pre-broadcast to (R, 1) columns.
    scale_col = jnp.tile(inv_std, N).reshape(R, 1)
    bias_col = jnp.tile(bias, N).reshape(R, 1)

    x = img.reshape(R, L)

    in_sz = jnp.dtype(in_dtype).itemsize
    out_sz = jnp.dtype(out_dtype).itemsize
    bpe = max(in_sz, out_sz)                       # conservative per-elem VMEM cost
    # Native sublane tile: 8 rows for 4-byte, 16 for 2-byte, 32 for 1-byte dtypes.
    r_align = max(32 // in_sz, 32 // out_sz)

    # --- lane-dense block selection -------------------------------------
    lane_budget = max(128, (target_block_bytes // (r_align * bpe)) // 128 * 128)
    if L % 128 == 0:
        block_c = min(L, lane_budget)
    elif L * r_align * bpe <= target_block_bytes:
        block_c = L                                # small odd row: full-extent block
    else:
        block_c = lane_budget                      # 128-multiple, masked trailing block

    rows_fit = max(1, target_block_bytes // (block_c * bpe))
    if rows_fit >= R:
        block_r = R
    else:
        block_r = min(R, max(r_align, (rows_fit // r_align) * r_align))

    # v7x: make sure the parallel grid has >=2 programs for a large tensor so
    # both TensorCores share the streaming (no-op for small inputs / v5e / v6e).
    total_bytes = R * L * bpe
    if pl.cdiv(R, block_r) * pl.cdiv(L, block_c) == 1 and total_bytes > 4 * 1024 * 1024:
        if R >= 2 * r_align:
            block_r = max(r_align, (R // 2 // r_align) * r_align)
        elif L % 128 == 0 and L >= 256:
            block_c = max(128, (L // 2 // 128) * 128)

    grid = (pl.cdiv(R, block_r), pl.cdiv(L, block_c))

    out2d = pl.pallas_call(
        _norm_kernel,
        out_shape=jax.ShapeDtypeStruct((R, L), out_dtype),
        grid=grid,
        in_specs=[
            pl.BlockSpec((block_r, 1), lambda i, j: (i, 0)),        # f32 scale column
            pl.BlockSpec((block_r, 1), lambda i, j: (i, 0)),        # f32 bias column
            pl.BlockSpec((block_r, block_c), lambda i, j: (i, j)),  # image tile (orig dtype)
        ],
        out_specs=pl.BlockSpec((block_r, block_c), lambda i, j: (i, j)),
        compiler_params=pltpu.CompilerParams(
            dimension_semantics=("parallel", "parallel"),
            vmem_limit_bytes=48 * 1024 * 1024,
        ),
    )(scale_col, bias_col, x)

    return out2d.reshape(N, C, H, W)


if __name__ == "__main__":
    key = jax.random.PRNGKey(0)
    N, C, H, W = 2, 4, 16, 16

    # Deterministic "parameters" (the constructor args of Normalization).
    mean = jnp.array([0.485, 0.456, 0.406, 0.5], dtype=jnp.float32)
    std = jnp.array([0.229, 0.224, 0.225, 0.25], dtype=jnp.float32)

    # --- float32 image path ---
    img = jax.random.uniform(key, (N, C, H, W), dtype=jnp.float32)
    out = normalize(img, mean, std)
    out = jax.block_until_ready(out)
    ref = (img - mean.reshape(-1, 1, 1)) / std.reshape(-1, 1, 1)
    assert out.shape == img.shape and out.dtype == img.dtype
    assert jnp.allclose(out, ref, rtol=1e-5, atol=1e-5)

    # --- uint8 image path (fused in-kernel cast) ---
    img_u8 = jax.random.randint(key, (N, C, H, W), 0, 256, dtype=jnp.int32).astype(jnp.uint8)
    out_u8 = normalize(img_u8, mean, std)
    out_u8 = jax.block_until_ready(out_u8)
    ref_u8 = (img_u8.astype(jnp.float32) - mean.reshape(-1, 1, 1)) / std.reshape(-1, 1, 1)
    assert out_u8.shape == img_u8.shape and out_u8.dtype == jnp.float32
    assert jnp.allclose(out_u8, ref_u8, rtol=1e-5, atol=1e-4)

    print("KERNEL_OK")
</pallas_src>

<mosaic_0001>
module attributes {stable_mosaic.version = 11 : i64} {
  func.func @_norm_kernel(%arg0: i32, %arg1: i32, %arg2: memref<8x1xf32, #tpu.memory_space<vmem>>, %arg3: memref<8x1xf32, #tpu.memory_space<vmem>>, %arg4: memref<8x256xf32, #tpu.memory_space<vmem>>, %arg5: memref<8x256xf32, #tpu.memory_space<vmem>>) attributes {dimension_semantics = [#tpu.dimension_semantics<parallel>, #tpu.dimension_semantics<parallel>], iteration_bounds = array<i64: 1, 1>, scalar_prefetch = 0 : i64, scratch_operands = 0 : i64, tpu.core_type = #tpu.core_type<tc>, window_params = [{transform_indices = @transform_0, window_bounds = array<i64: 8, 1>}, {transform_indices = @transform_1, window_bounds = array<i64: 8, 1>}, {transform_indices = @transform_2, window_bounds = array<i64: 8, 256>}, {transform_indices = @transform_3, window_bounds = array<i64: 8, 256>}]} {
    %c0 = arith.constant 0 : index
    %c0_0 = arith.constant 0 : index
    %0 = vector.load %arg4[%c0, %c0_0] : memref<8x256xf32, #tpu.memory_space<vmem>>, vector<8x256xf32>
    %c0_1 = arith.constant 0 : index
    %c0_2 = arith.constant 0 : index
    %1 = vector.load %arg2[%c0_1, %c0_2] : memref<8x1xf32, #tpu.memory_space<vmem>>, vector<8x1xf32>
    %2 = vector.broadcast %1 : vector<8x1xf32> to vector<8x256xf32>
    %3 = arith.mulf %0, %2 : vector<8x256xf32>
    %c0_3 = arith.constant 0 : index
    %c0_4 = arith.constant 0 : index
    %4 = vector.load %arg3[%c0_3, %c0_4] : memref<8x1xf32, #tpu.memory_space<vmem>>, vector<8x1xf32>
    %5 = vector.broadcast %4 : vector<8x1xf32> to vector<8x256xf32>
    %6 = arith.addf %3, %5 : vector<8x256xf32>
    %c0_5 = arith.constant 0 : index
    %c0_6 = arith.constant 0 : index
    %7 = vector.load %arg5[%c0_5, %c0_6] : memref<8x256xf32, #tpu.memory_space<vmem>>, vector<8x256xf32>
    tpu.vector_store %arg5[%c0_5, %c0_6], %6 {strides = array<i32>} : memref<8x256xf32, #tpu.memory_space<vmem>>, vector<8x256xf32>,
    return
  }
  func.func @transform_0(%arg0: i32, %arg1: i32) -> (i32, i32) {
    %c0_i32 = arith.constant 0 : i32
    %c0_i32_0 = arith.constant 0 : i32
    return %arg0, %c0_i32 : i32, i32
  }
  func.func @transform_1(%arg0: i32, %arg1: i32) -> (i32, i32) {
    %c0_i32 = arith.constant 0 : i32
    %c0_i32_0 = arith.constant 0 : i32
    return %arg0, %c0_i32 : i32, i32
  }
  func.func @transform_2(%arg0: i32, %arg1: i32) -> (i32, i32) {
    %c0_i32 = arith.constant 0 : i32
    return %arg0, %arg1 : i32, i32
  }
  func.func @transform_3(%arg0: i32, %arg1: i32) -> (i32, i32) {
    %c0_i32 = arith.constant 0 : i32
    return %arg0, %arg1 : i32, i32
  }
}

</mosaic_0001>

<bundles_post_ra>
// kernel: tpu_custom_call.1
= control target key start
LH: loop header
LB: loop body
LE: loop exit
PB: predicated region body
PF: predicated region fallthrough
CT: control target
= control target key end

     0   :  { %s122_s0 = inlined_call_operand.vmem [shape: f32[8,1], index: 0, kind: input, shape index: {}]   ;;  %s123_s1 = inlined_call_operand.vmem [shape: f32[8,1], index: 1, kind: input, shape index: {}]   ;;  %s124_s2 = inlined_call_operand.vmem [shape: f32[8,256], index: 2, kind: input, shape index: {}]   ;;  %s125_s3 = inlined_call_operand.hbm [shape: f32[8,256], index: 3, kind: output, shape index: {}]  }
   0x1   :  { %v17_v0 = vld [vmem:[%s122_s0] sm:$0xff] }
   0x2   :  { %8 = vsyncpa [#allocation3], 0  ;;  %v76_v1 = vmov 0   ;;  %v25_v2 = vld [vmem:[%s123_s1] sm:$0xff]  ;;  %v16_v5 = vld [vmem:[%s124_s2 + $0x8] sm:$0xff]  ;;  %s77_s20 = smov [#allocation2]  }
   0x3   :  { %51 = vset.pattern.permute.xlu0 %v76_v1  ;;  %v15_v4 = vld [vmem:[%s124_s2] sm:$0xff]  ;;  %s41_s0 = sshll.u32 %s77_s20, 4  ;;  %s42_s0 = int_to_ptr.vmem [resolvable:$true] %s41_s0 }
   0x4   :  { %20 = vperm.xlu0 %51, %v17_v0   ;;  %s52_s1 = scalar_lea.vmem %s42_s0, 256  ;;  %p57_p1 = scmp.lt.s32.totalorder %s42_s0, %s42_s0 }
   0x5   :  { %p53_p0 = scmp.ne.s32.totalorder %s42_s0, %s52_s1  ;;  %p58_p2 = scmp.lt.s32.totalorder %s52_s1, %s52_s1 }
   0x7   :  { %p59_p3 = por %p58_p2, %p57_p1 }
   0x8   :  { %28 = vperm.xlu0 %51, %v25_v2  }
   0x9   :  { %p60_p4 = pnand %p59_p3, %p53_p0 }
  0x83   :  { %v21_v3 = vpop.permute.xlu0 %20 }
  0x84   :  { %v23_v6 = vmul.f32 %v21_v3, %v15_v4  ;;  %v24_v7 = vmul.f32 %v21_v3, %v16_v5 }
  0x87   :  { %v29_v8 = vpop.permute.xlu0 %28 }
  0x88   :  { %v31_v9 = vadd.f32 %v29_v8, %v23_v6  ;;  %v32_v10 = vadd.f32 %v29_v8, %v24_v7 }
  0x8a   :  { %33 = vst [vmem:[#allocation2] sm:$0xff] %v31_v9  ;;  %34 = vst [vmem:[#allocation2 + $0x8] sm:$0xff] %v32_v10 }
  0x8b   :  { %63 = shalt.err (!%p60_p4)
}
  0x8c   :  { %s64_s2 = scalar_lea.hbm %s125_s3, 256 }
  0x8d   :  { %p65_p5 = scmp.ne.s32.totalorder %s125_s3, %s64_s2  ;;  %p68_p6 = scmp.lt.u32.totalorder %s64_s2, %s125_s3 }
  0x8f   :  { %p70_p7 = pnand %p68_p6, %p65_p5 }
  0x91   :  { %73 = shalt.err (!%p70_p7)
}
  0x92   :  { %44 = dma.vmem_to_hbm [thread:$0]  %s42_s0, 256, %s125_s3, [#allocation3]  }
  0x93   :  { %74 = dma.done.wait [#allocation3], 256  }
  0x94   :  { %75 = vsyncadd [#allocation3], 4294967040 }
  0x95   :  { %48 = vsyncpa [#allocation3], 1 }

</bundles_post_ra>
